<compile_context>
chip_gen: v7x
topology: tpu7x:2x2x1
jax: 0.10.0
libtpu: 0.0.40
codegen_flags: <defaults>
</compile_context>

<pallas_src>
from collections import namedtuple

import jax
import jax.numpy as jnp
from jax.experimental import pallas as pl
from jax.experimental.pallas import tpu as pltpu

LANE = 128
SUBLANE = 8


def _round_up(x, m):
    return ((x + m - 1) // m) * m


def _choose_tile_m(m):
    """TM: multiple of 16 (bf16 sublane pack), <= 1024, preferably a divisor
    of M (no row padding) with a grid of >= 4 steps (both v7x TCs pipelined)."""
    MIN_TM, CAP = 16, 1024
    if m <= MIN_TM:
        return MIN_TM
    limit = min(CAP, m)
    for min_steps in (4, 2, 1):
        best = 0
        tm = MIN_TM
        while tm <= limit:
            if m % tm == 0 and m // tm >= min_steps:
                best = tm
            tm += MIN_TM
        if best:
            return best
    # No multiple-of-16 divisor: fall back to row padding with ~4 grid steps.
    return max(MIN_TM, min(CAP, _round_up(pl.cdiv(m, 4), MIN_TM)))


def _vmem_limit_bytes(need):
    """Generation-aware VMEM limit: ~75% of physical capacity as ceiling,
    modest floor for compiler scratch headroom."""
    cap = 64 * 1024 * 1024
    try:
        info = pltpu.get_tpu_info()
        cap = int(getattr(info, "vmem_capacity_bytes", cap)) or cap
    except Exception:
        pass
    ceiling = (cap * 3) // 4
    return int(min(max(4 * need, 16 * 1024 * 1024), ceiling))


# ----------------------------- Pallas kernel ------------------------------ #
def _mfm_matmul_kernel(x_ref, w_ref, b_ref, o_ref):
    # x_ref: (TM, Kp) bf16   w_ref: (Kp, 2*Cp) bf16   b_ref: (1, 2*Cp) f32
    # o_ref: (TM, Cp) bf16
    acc = jnp.dot(x_ref[...], w_ref[...], preferred_element_type=jnp.float32)
    acc = acc + b_ref[...]
    cp = o_ref.shape[-1]
    # Halves are 128-lane aligned -> the split + max is a pure VPU op.
    o_ref[...] = jnp.maximum(acc[:, :cp], acc[:, cp:]).astype(o_ref.dtype)


def _mfm_matmul(x, w, b, tm, *, real_m, real_k, real_c):
    """x: (Mp, Kp) bf16, w: (Kp, 2*Cp) bf16, b: (1, 2*Cp) f32 -> (Mp, Cp) bf16."""
    mp, kp = x.shape
    _, two_cp = w.shape
    cp = two_cp // 2
    assert mp % tm == 0
    grid = (mp // tm,)

    # Advisory scheduling hints from the REAL (unpadded) problem size.
    flops = 2 * real_m * real_k * (2 * real_c)
    bytes_accessed = (real_m * real_k * 2        # bf16 patches read
                      + real_k * 2 * real_c * 2  # bf16 weights
                      + 2 * real_c * 4           # f32 bias
                      + real_m * real_c * 2)     # bf16 output write

    vmem_need = (2 * tm * kp * 2          # double-buffered X block
                 + 2 * kp * two_cp * 2    # resident W (counted 2x for safety)
                 + 2 * two_cp * 4         # bias
                 + 2 * tm * cp * 2        # double-buffered output block
                 + tm * two_cp * 4)       # f32 accumulator value
    vmem_limit = _vmem_limit_bytes(vmem_need)

    return pl.pallas_call(
        _mfm_matmul_kernel,
        out_shape=jax.ShapeDtypeStruct((mp, cp), jnp.bfloat16),
        grid_spec=pltpu.PrefetchScalarGridSpec(
            num_scalar_prefetch=0,
            grid=grid,
            in_specs=[
                pl.BlockSpec((tm, kp), lambda i: (i, 0)),
                pl.BlockSpec((kp, two_cp), lambda i: (0, 0)),
                pl.BlockSpec((1, two_cp), lambda i: (0, 0)),
            ],
            out_specs=pl.BlockSpec((tm, cp), lambda i: (i, 0)),
        ),
        compiler_params=pltpu.CompilerParams(
            dimension_semantics=("parallel",),
            vmem_limit_bytes=vmem_limit,
        ),
        cost_estimate=pl.CostEstimate(
            flops=int(flops), transcendentals=0,
            bytes_accessed=int(bytes_accessed)),
    )(x, w, b)


# ------------------------------- glue (JAX) -------------------------------- #
def _pack_mfm_weights(weight, bias, out_channels, k_pad_to=None):
    """PyTorch Conv2d params -> one wide, lane-padded, bf16 GEMM operand.

    weight: (2*Cout, Cin, kh, kw), bias: (2*Cout,)
    returns w (Kp, 2*Cp) bf16 with halves at [0:Cp] / [Cp:2Cp] (real channels
    first, padded lanes & padded K rows exactly zero), b (1, 2*Cp) f32.
    """
    two_c, cin, kh, kw = weight.shape
    assert two_c == 2 * out_channels
    k = kh * kw * cin
    kp = _round_up(k, SUBLANE)
    if k_pad_to is not None:
        kp = max(kp, int(k_pad_to))
    cp = _round_up(out_channels, LANE)
    # (2*Cout, Cin, kh, kw) -> (kh, kw, Cin, 2*Cout) -> (K, 2*Cout); tap order (kh,kw,Cin)
    wm = jnp.transpose(weight, (2, 3, 1, 0)).reshape(k, 2 * out_channels)
    w_wide = jnp.zeros((kp, 2 * cp), jnp.float32)
    w_wide = w_wide.at[:k, :out_channels].set(wm[:, :out_channels])
    w_wide = w_wide.at[:k, cp:cp + out_channels].set(wm[:, out_channels:])
    b_wide = jnp.zeros((1, 2 * cp), jnp.float32)
    b_wide = b_wide.at[0, :out_channels].set(bias[:out_channels])
    b_wide = b_wide.at[0, cp:cp + out_channels].set(bias[out_channels:])
    return w_wide.astype(jnp.bfloat16), b_wide


def _im2col_nhwc_bf16(x_nhwc, kh, kw, stride, padding, kp):
    """(N,H,W,C) -> ((N*Ho*Wo, Kp) bf16, Ho, Wo); tap order (kh, kw, C).
    K is padded to Kp inside the tap concatenation (no separate pad pass)."""
    n, h, w, c = x_nhwc.shape
    x = x_nhwc.astype(jnp.bfloat16)
    ho = (h + 2 * padding - kh) // stride + 1
    wo = (w + 2 * padding - kw) // stride + 1
    k = kh * kw * c
    assert kp >= k
    if kh == 1 and kw == 1 and stride == 1 and padding == 0:
        xf = x.reshape(n * ho * wo, c)
        if kp > c:                      # only the (tiny) network-boundary case
            xf = jnp.pad(xf, ((0, 0), (0, kp - c)))
        return xf, ho, wo
    if padding:
        x = jnp.pad(x, ((0, 0), (padding, padding), (padding, padding), (0, 0)))
    taps = []
    for i in range(kh):
        for j in range(kw):
            taps.append(x[:, i:i + ho * stride:stride, j:j + wo * stride:stride, :])
    if kp > k:
        taps.append(jnp.zeros((n, ho, wo, kp - k), jnp.bfloat16))
    patches = jnp.concatenate(taps, axis=-1)
    return patches.reshape(n * ho * wo, kp), ho, wo


def mfm_conv2d_nhwc(x_nhwc, w_packed, b_packed, kh, kw, stride, padding,
                    *, out_channels, real_k):
    """Fused Conv2d(Cin, 2*Cout, k, s, p) + bias + mfm max.
    NHWC in (possibly with zero-padded extra channels) -> lane-padded
    (N, Ho, Wo, Cp) bf16 out (real channels first, padded lanes exactly 0)."""
    n = x_nhwc.shape[0]
    kp, two_cp = w_packed.shape
    cp = two_cp // 2
    patches, ho, wo = _im2col_nhwc_bf16(x_nhwc, kh, kw, stride, padding, kp)
    m = patches.shape[0]
    tm = _choose_tile_m(m)
    mp = _round_up(m, tm)
    if mp != m:
        patches = jnp.pad(patches, ((0, mp - m), (0, 0)))
    out = _mfm_matmul(patches, w_packed, b_packed, tm,
                      real_m=m, real_k=real_k, real_c=out_channels)
    if mp != m:
        out = out[:m]
    return out.reshape(n, ho, wo, cp)


class GroupPallas:
    """Pallas equivalent of `group(in_channels, out_channels, k, s, p)`.
    IO is lane-padded NHWC bf16: the input may carry zero-padded extra
    channels; the output is (N, Ho, Wo, round_up(out_channels,128))."""

    def __init__(self, in_channels, out_channels, kernel_size, stride, padding,
                 key=None):
        if key is None:
            key = jax.random.PRNGKey(0)
        self.in_channels = in_channels
        self.out_channels = out_channels
        self.kernel_size = kernel_size
        self.stride = stride
        self.padding = padding

        k0, k1, k2, k3 = jax.random.split(key, 4)

        # conv_a: Conv2d(Cin, 2*Cin, 1, 1, 0)
        bnd_a = 1.0 / jnp.sqrt(in_channels)
        self.wa = jax.random.uniform(k0, (2 * in_channels, in_channels, 1, 1),
                                     jnp.float32, -bnd_a, bnd_a)
        self.ba = jax.random.uniform(k1, (2 * in_channels,), jnp.float32, -bnd_a, bnd_a)

        # conv: Conv2d(Cin, 2*Cout, k, s, p)
        bnd_b = 1.0 / jnp.sqrt(in_channels * kernel_size * kernel_size)
        self.wb = jax.random.uniform(
            k2, (2 * out_channels, in_channels, kernel_size, kernel_size),
            jnp.float32, -bnd_b, bnd_b)
        self.bb = jax.random.uniform(k3, (2 * out_channels,), jnp.float32, -bnd_b, bnd_b)

        # k×k conv operands are fixed (input sliced to real in_channels first).
        self.wb_packed, self.bb_packed = _pack_mfm_weights(self.wb, self.bb, out_channels)
        # conv_a operands depend on the incoming (possibly lane-padded) channel
        # count -> packed lazily and cached (padded K rows are zero).
        self._wa_cache = {}

    def _conv_a_operands(self, c_incoming):
        if c_incoming not in self._wa_cache:
            self._wa_cache[c_incoming] = _pack_mfm_weights(
                self.wa, self.ba, self.in_channels,
                k_pad_to=_round_up(c_incoming, SUBLANE))
        return self._wa_cache[c_incoming]

    def __call__(self, x_nhwc):
        # conv_a (1x1 mfm): consume the lane-padded incoming buffer directly
        # (no slice / re-pad round trip between groups).
        wa, ba = self._conv_a_operands(x_nhwc.shape[-1])
        x = mfm_conv2d_nhwc(x_nhwc, wa, ba, 1, 1, 1, 0,
                            out_channels=self.in_channels,
                            real_k=self.in_channels)
        # k×k mfm conv: slice to the real channels first so the im2col patch
        # width stays kh*kw*Cin rather than kh*kw*128.
        x = x[..., : self.in_channels]
        x = mfm_conv2d_nhwc(x, self.wb_packed, self.bb_packed,
                            self.kernel_size, self.kernel_size,
                            self.stride, self.padding,
                            out_channels=self.out_channels,
                            real_k=self.in_channels * self.kernel_size * self.kernel_size)
        return x


class ExtractFeatureNetworkPallas:
    """Pallas equivalent of ExtractFeatureNetwork: run submodules in order,
    tap the mapped layers, return a namedtuple of features (NCHW, f32)."""

    def __init__(self, model_modules, layer_mapping):
        self.modules = list(model_modules.items())
        self.layer_name_mapping = dict(layer_mapping)
        self.feature_output = namedtuple("FeatureDic", list(self.layer_name_mapping.values()))

    def __call__(self, x_nchw):
        # One NCHW->NHWC transpose in; the chain stays lane-padded NHWC bf16.
        x = jnp.transpose(x_nchw, (0, 2, 3, 1)).astype(jnp.bfloat16)
        output = {}
        for name, module in self.modules:
            x = module(x)
            if name in self.layer_name_mapping:
                feat = x[..., : module.out_channels]     # drop padded lanes at taps only
                output[self.layer_name_mapping[name]] = (
                    jnp.transpose(feat, (0, 3, 1, 2)).astype(jnp.float32))
        return self.feature_output(**output)


# --------------------------- pure-JAX reference ---------------------------- #
def _mfm_conv_ref(x, w, b, out_channels, stride, padding):
    y = jax.lax.conv_general_dilated(
        x, w, window_strides=(stride, stride),
        padding=[(padding, padding), (padding, padding)],
        dimension_numbers=("NCHW", "OIHW", "NCHW"))
    y = y + b.reshape(1, -1, 1, 1)
    return jnp.maximum(y[:, :out_channels], y[:, out_channels:])


def _group_ref(mod, x):
    x = _mfm_conv_ref(x, mod.wa, mod.ba, mod.in_channels, 1, 0)
    x = _mfm_conv_ref(x, mod.wb, mod.bb, mod.out_channels, mod.stride, mod.padding)
    return x


def _extract_ref(net, x_nchw):
    output = {}
    x = x_nchw
    for name, module in net.modules:
        x = _group_ref(module, x)
        if name in net.layer_name_mapping:
            output[net.layer_name_mapping[name]] = x
    return net.feature_output(**output)


# --------------------------------- main ------------------------------------ #
if __name__ == "__main__":
    key = jax.random.PRNGKey(0)
    k_in, k1, k2 = jax.random.split(key, 3)

    N, Cin, H, W = 2, 4, 16, 16
    x = jax.random.normal(k_in, (N, Cin, H, W), jnp.float32)

    model = {
        "group1": GroupPallas(4, 8, 3, 1, 1, key=k1),
        "group2": GroupPallas(8, 16, 3, 1, 1, key=k2),
    }
    layer_mapping = {"group1": "feat_a", "group2": "feat_b"}

    net = ExtractFeatureNetworkPallas(model, layer_mapping)

    fwd = jax.jit(net.__call__)
    feats = jax.block_until_ready(fwd(x))
    ref = jax.block_until_ready(_extract_ref(net, x))

    assert feats.feat_a.shape == (N, 8, H, W), feats.feat_a.shape
    assert feats.feat_b.shape == (N, 16, H, W), feats.feat_b.shape

    # bf16 MXU inputs + bf16 inter-layer activations with f32 accumulation:
    # compare against the f32 reference with a tolerance scaled to magnitude.
    for got, want in zip(feats, ref):
        scale = float(jnp.max(jnp.abs(want))) + 1e-6
        err = float(jnp.max(jnp.abs(got - want)))
        assert err <= 5e-2 * scale, ("mismatch vs reference", err, scale)

    print("KERNEL_OK")
</pallas_src>

<mosaic_0001>
module attributes {stable_mosaic.version = 11 : i64} {
  func.func @_mfm_matmul_kernel(%arg0: i32, %arg1: memref<128x8xbf16, #tpu.memory_space<vmem>>, %arg2: memref<8x256xbf16, #tpu.memory_space<vmem>>, %arg3: memref<1x256xf32, #tpu.memory_space<vmem>>, %arg4: memref<128x128xbf16, #tpu.memory_space<vmem>>) attributes {dimension_semantics = [#tpu.dimension_semantics<parallel>], iteration_bounds = array<i64: 4>, scalar_prefetch = 0 : i64, scratch_operands = 0 : i64, tpu.core_type = #tpu.core_type<tc>, window_params = [{transform_indices = @transform_0, window_bounds = array<i64: 128, 8>}, {pipeline_mode = #tpu.pipeline_mode<synchronous>, transform_indices = @transform_1, window_bounds = array<i64: 8, 256>}, {pipeline_mode = #tpu.pipeline_mode<synchronous>, transform_indices = @transform_2, window_bounds = array<i64: 1, 256>}, {transform_indices = @transform_3, window_bounds = array<i64: 128, 128>}]} {
    %c0 = arith.constant 0 : index
    %c0_0 = arith.constant 0 : index
    %0 = vector.load %arg1[%c0, %c0_0] : memref<128x8xbf16, #tpu.memory_space<vmem>>, vector<128x8xbf16>
    %c0_1 = arith.constant 0 : index
    %c0_2 = arith.constant 0 : index
    %1 = vector.load %arg2[%c0_1, %c0_2] : memref<8x256xbf16, #tpu.memory_space<vmem>>, vector<8x256xbf16>
    %cst = arith.constant dense<0.000000e+00> : vector<128x256xf32>
    %2 = tpu.matmul %0, %1, %cst {dimension_numbers = #tpu.dot_dimension_numbers<[1], [0], [0], [1], [0, 0, 1, 1], [], []>} : vector<128x8xbf16>, vector<8x256xbf16>, vector<128x256xf32> -> vector<128x256xf32>
    %c0_3 = arith.constant 0 : index
    %c0_4 = arith.constant 0 : index
    %3 = vector.load %arg3[%c0_3, %c0_4] : memref<1x256xf32, #tpu.memory_space<vmem>>, vector<1x256xf32>
    %4 = vector.broadcast %3 : vector<1x256xf32> to vector<128x256xf32>
    %5 = arith.addf %2, %4 : vector<128x256xf32>
    %6 = vector.extract_strided_slice %5 {offsets = [0, 0], sizes = [128, 128], strides = [1, 1]} : vector<128x256xf32> to vector<128x128xf32>
    %7 = vector.extract_strided_slice %5 {offsets = [0, 128], sizes = [128, 128], strides = [1, 1]} : vector<128x256xf32> to vector<128x128xf32>
    %8 = arith.maximumf %6, %7 : vector<128x128xf32>
    %9 = arith.truncf %8 : vector<128x128xf32> to vector<128x128xbf16>
    %c0_5 = arith.constant 0 : index
    %c0_6 = arith.constant 0 : index
    %10 = vector.load %arg4[%c0_5, %c0_6] : memref<128x128xbf16, #tpu.memory_space<vmem>>, vector<128x128xbf16>
    tpu.vector_store %arg4[%c0_5, %c0_6], %9 {strides = array<i32>} : memref<128x128xbf16, #tpu.memory_space<vmem>>, vector<128x128xbf16>,
    return
  }
  func.func @transform_0(%arg0: i32) -> (i32, i32) {
    %c0_i32 = arith.constant 0 : i32
    %c0_i32_0 = arith.constant 0 : i32
    return %arg0, %c0_i32 : i32, i32
  }
  func.func @transform_1(%arg0: i32) -> (i32, i32) {
    %c0_i32 = arith.constant 0 : i32
    %c0_i32_0 = arith.constant 0 : i32
    %c0_i32_1 = arith.constant 0 : i32
    return %c0_i32, %c0_i32_0 : i32, i32
  }
  func.func @transform_2(%arg0: i32) -> (i32, i32) {
    %c0_i32 = arith.constant 0 : i32
    %c0_i32_0 = arith.constant 0 : i32
    %c0_i32_1 = arith.constant 0 : i32
    return %c0_i32, %c0_i32_0 : i32, i32
  }
  func.func @transform_3(%arg0: i32) -> (i32, i32) {
    %c0_i32 = arith.constant 0 : i32
    %c0_i32_0 = arith.constant 0 : i32
    return %arg0, %c0_i32 : i32, i32
  }
}

module attributes {stable_mosaic.version = 11 : i64} {
  func.func @_mfm_matmul_kernel(%arg0: i32, %arg1: memref<128x40xbf16, #tpu.memory_space<vmem>>, %arg2: memref<40x256xbf16, #tpu.memory_space<vmem>>, %arg3: memref<1x256xf32, #tpu.memory_space<vmem>>, %arg4: memref<128x128xbf16, #tpu.memory_space<vmem>>) attributes {dimension_semantics = [#tpu.dimension_semantics<parallel>], iteration_bounds = array<i64: 4>, scalar_prefetch = 0 : i64, scratch_operands = 0 : i64, tpu.core_type = #tpu.core_type<tc>, window_params = [{transform_indices = @transform_0, window_bounds = array<i64: 128, 40>}, {pipeline_mode = #tpu.pipeline_mode<synchronous>, transform_indices = @transform_1, window_bounds = array<i64: 40, 256>}, {pipeline_mode = #tpu.pipeline_mode<synchronous>, transform_indices = @transform_2, window_bounds = array<i64: 1, 256>}, {transform_indices = @transform_3, window_bounds = array<i64: 128, 128>}]} {
    %c0 = arith.constant 0 : index
    %c0_0 = arith.constant 0 : index
    %0 = vector.load %arg1[%c0, %c0_0] : memref<128x40xbf16, #tpu.memory_space<vmem>>, vector<128x40xbf16>
    %c0_1 = arith.constant 0 : index
    %c0_2 = arith.constant 0 : index
    %1 = vector.load %arg2[%c0_1, %c0_2] : memref<40x256xbf16, #tpu.memory_space<vmem>>, vector<40x256xbf16>
    %cst = arith.constant dense<0.000000e+00> : vector<128x256xf32>
    %2 = tpu.matmul %0, %1, %cst {dimension_numbers = #tpu.dot_dimension_numbers<[1], [0], [0], [1], [0, 0, 1, 1], [], []>} : vector<128x40xbf16>, vector<40x256xbf16>, vector<128x256xf32> -> vector<128x256xf32>
    %c0_3 = arith.constant 0 : index
    %c0_4 = arith.constant 0 : index
    %3 = vector.load %arg3[%c0_3, %c0_4] : memref<1x256xf32, #tpu.memory_space<vmem>>, vector<1x256xf32>
    %4 = vector.broadcast %3 : vector<1x256xf32> to vector<128x256xf32>
    %5 = arith.addf %2, %4 : vector<128x256xf32>
    %6 = vector.extract_strided_slice %5 {offsets = [0, 0], sizes = [128, 128], strides = [1, 1]} : vector<128x256xf32> to vector<128x128xf32>
    %7 = vector.extract_strided_slice %5 {offsets = [0, 128], sizes = [128, 128], strides = [1, 1]} : vector<128x256xf32> to vector<128x128xf32>
    %8 = arith.maximumf %6, %7 : vector<128x128xf32>
    %9 = arith.truncf %8 : vector<128x128xf32> to vector<128x128xbf16>
    %c0_5 = arith.constant 0 : index
    %c0_6 = arith.constant 0 : index
    %10 = vector.load %arg4[%c0_5, %c0_6] : memref<128x128xbf16, #tpu.memory_space<vmem>>, vector<128x128xbf16>
    tpu.vector_store %arg4[%c0_5, %c0_6], %9 {strides = array<i32>} : memref<128x128xbf16, #tpu.memory_space<vmem>>, vector<128x128xbf16>,
    return
  }
  func.func @transform_0(%arg0: i32) -> (i32, i32) {
    %c0_i32 = arith.constant 0 : i32
    %c0_i32_0 = arith.constant 0 : i32
    return %arg0, %c0_i32 : i32, i32
  }
  func.func @transform_1(%arg0: i32) -> (i32, i32) {
    %c0_i32 = arith.constant 0 : i32
    %c0_i32_0 = arith.constant 0 : i32
    %c0_i32_1 = arith.constant 0 : i32
    return %c0_i32, %c0_i32_0 : i32, i32
  }
  func.func @transform_2(%arg0: i32) -> (i32, i32) {
    %c0_i32 = arith.constant 0 : i32
    %c0_i32_0 = arith.constant 0 : i32
    %c0_i32_1 = arith.constant 0 : i32
    return %c0_i32, %c0_i32_0 : i32, i32
  }
  func.func @transform_3(%arg0: i32) -> (i32, i32) {
    %c0_i32 = arith.constant 0 : i32
    %c0_i32_0 = arith.constant 0 : i32
    return %arg0, %c0_i32 : i32, i32
  }
}

module attributes {stable_mosaic.version = 11 : i64} {
  func.func @_mfm_matmul_kernel(%arg0: i32, %arg1: memref<128x128xbf16, #tpu.memory_space<vmem>>, %arg2: memref<128x256xbf16, #tpu.memory_space<vmem>>, %arg3: memref<1x256xf32, #tpu.memory_space<vmem>>, %arg4: memref<128x128xbf16, #tpu.memory_space<vmem>>) attributes {dimension_semantics = [#tpu.dimension_semantics<parallel>], iteration_bounds = array<i64: 4>, scalar_prefetch = 0 : i64, scratch_operands = 0 : i64, tpu.core_type = #tpu.core_type<tc>, window_params = [{transform_indices = @transform_0, window_bounds = array<i64: 128, 128>}, {pipeline_mode = #tpu.pipeline_mode<synchronous>, transform_indices = @transform_1, window_bounds = array<i64: 128, 256>}, {pipeline_mode = #tpu.pipeline_mode<synchronous>, transform_indices = @transform_2, window_bounds = array<i64: 1, 256>}, {transform_indices = @transform_3, window_bounds = array<i64: 128, 128>}]} {
    %c0 = arith.constant 0 : index
    %c0_0 = arith.constant 0 : index
    %0 = vector.load %arg1[%c0, %c0_0] : memref<128x128xbf16, #tpu.memory_space<vmem>>, vector<128x128xbf16>
    %c0_1 = arith.constant 0 : index
    %c0_2 = arith.constant 0 : index
    %1 = vector.load %arg2[%c0_1, %c0_2] : memref<128x256xbf16, #tpu.memory_space<vmem>>, vector<128x256xbf16>
    %cst = arith.constant dense<0.000000e+00> : vector<128x256xf32>
    %2 = tpu.matmul %0, %1, %cst {dimension_numbers = #tpu.dot_dimension_numbers<[1], [0], [0], [1], [0, 0, 1, 1], [], []>} : vector<128x128xbf16>, vector<128x256xbf16>, vector<128x256xf32> -> vector<128x256xf32>
    %c0_3 = arith.constant 0 : index
    %c0_4 = arith.constant 0 : index
    %3 = vector.load %arg3[%c0_3, %c0_4] : memref<1x256xf32, #tpu.memory_space<vmem>>, vector<1x256xf32>
    %4 = vector.broadcast %3 : vector<1x256xf32> to vector<128x256xf32>
    %5 = arith.addf %2, %4 : vector<128x256xf32>
    %6 = vector.extract_strided_slice %5 {offsets = [0, 0], sizes = [128, 128], strides = [1, 1]} : vector<128x256xf32> to vector<128x128xf32>
    %7 = vector.extract_strided_slice %5 {offsets = [0, 128], sizes = [128, 128], strides = [1, 1]} : vector<128x256xf32> to vector<128x128xf32>
    %8 = arith.maximumf %6, %7 : vector<128x128xf32>
    %9 = arith.truncf %8 : vector<128x128xf32> to vector<128x128xbf16>
    %c0_5 = arith.constant 0 : index
    %c0_6 = arith.constant 0 : index
    %10 = vector.load %arg4[%c0_5, %c0_6] : memref<128x128xbf16, #tpu.memory_space<vmem>>, vector<128x128xbf16>
    tpu.vector_store %arg4[%c0_5, %c0_6], %9 {strides = array<i32>} : memref<128x128xbf16, #tpu.memory_space<vmem>>, vector<128x128xbf16>,
    return
  }
  func.func @transform_0(%arg0: i32) -> (i32, i32) {
    %c0_i32 = arith.constant 0 : i32
    %c0_i32_0 = arith.constant 0 : i32
    return %arg0, %c0_i32 : i32, i32
  }
  func.func @transform_1(%arg0: i32) -> (i32, i32) {
    %c0_i32 = arith.constant 0 : i32
    %c0_i32_0 = arith.constant 0 : i32
    %c0_i32_1 = arith.constant 0 : i32
    return %c0_i32, %c0_i32_0 : i32, i32
  }
  func.func @transform_2(%arg0: i32) -> (i32, i32) {
    %c0_i32 = arith.constant 0 : i32
    %c0_i32_0 = arith.constant 0 : i32
    %c0_i32_1 = arith.constant 0 : i32
    return %c0_i32, %c0_i32_0 : i32, i32
  }
  func.func @transform_3(%arg0: i32) -> (i32, i32) {
    %c0_i32 = arith.constant 0 : i32
    %c0_i32_0 = arith.constant 0 : i32
    return %arg0, %c0_i32 : i32, i32
  }
}

module attributes {stable_mosaic.version = 11 : i64} {
  func.func @_mfm_matmul_kernel(%arg0: i32, %arg1: memref<128x72xbf16, #tpu.memory_space<vmem>>, %arg2: memref<72x256xbf16, #tpu.memory_space<vmem>>, %arg3: memref<1x256xf32, #tpu.memory_space<vmem>>, %arg4: memref<128x128xbf16, #tpu.memory_space<vmem>>) attributes {dimension_semantics = [#tpu.dimension_semantics<parallel>], iteration_bounds = array<i64: 4>, scalar_prefetch = 0 : i64, scratch_operands = 0 : i64, tpu.core_type = #tpu.core_type<tc>, window_params = [{transform_indices = @transform_0, window_bounds = array<i64: 128, 72>}, {pipeline_mode = #tpu.pipeline_mode<synchronous>, transform_indices = @transform_1, window_bounds = array<i64: 72, 256>}, {pipeline_mode = #tpu.pipeline_mode<synchronous>, transform_indices = @transform_2, window_bounds = array<i64: 1, 256>}, {transform_indices = @transform_3, window_bounds = array<i64: 128, 128>}]} {
    %c0 = arith.constant 0 : index
    %c0_0 = arith.constant 0 : index
    %0 = vector.load %arg1[%c0, %c0_0] : memref<128x72xbf16, #tpu.memory_space<vmem>>, vector<128x72xbf16>
    %c0_1 = arith.constant 0 : index
    %c0_2 = arith.constant 0 : index
    %1 = vector.load %arg2[%c0_1, %c0_2] : memref<72x256xbf16, #tpu.memory_space<vmem>>, vector<72x256xbf16>
    %cst = arith.constant dense<0.000000e+00> : vector<128x256xf32>
    %2 = tpu.matmul %0, %1, %cst {dimension_numbers = #tpu.dot_dimension_numbers<[1], [0], [0], [1], [0, 0, 1, 1], [], []>} : vector<128x72xbf16>, vector<72x256xbf16>, vector<128x256xf32> -> vector<128x256xf32>
    %c0_3 = arith.constant 0 : index
    %c0_4 = arith.constant 0 : index
    %3 = vector.load %arg3[%c0_3, %c0_4] : memref<1x256xf32, #tpu.memory_space<vmem>>, vector<1x256xf32>
    %4 = vector.broadcast %3 : vector<1x256xf32> to vector<128x256xf32>
    %5 = arith.addf %2, %4 : vector<128x256xf32>
    %6 = vector.extract_strided_slice %5 {offsets = [0, 0], sizes = [128, 128], strides = [1, 1]} : vector<128x256xf32> to vector<128x128xf32>
    %7 = vector.extract_strided_slice %5 {offsets = [0, 128], sizes = [128, 128], strides = [1, 1]} : vector<128x256xf32> to vector<128x128xf32>
    %8 = arith.maximumf %6, %7 : vector<128x128xf32>
    %9 = arith.truncf %8 : vector<128x128xf32> to vector<128x128xbf16>
    %c0_5 = arith.constant 0 : index
    %c0_6 = arith.constant 0 : index
    %10 = vector.load %arg4[%c0_5, %c0_6] : memref<128x128xbf16, #tpu.memory_space<vmem>>, vector<128x128xbf16>
    tpu.vector_store %arg4[%c0_5, %c0_6], %9 {strides = array<i32>} : memref<128x128xbf16, #tpu.memory_space<vmem>>, vector<128x128xbf16>,
    return
  }
  func.func @transform_0(%arg0: i32) -> (i32, i32) {
    %c0_i32 = arith.constant 0 : i32
    %c0_i32_0 = arith.constant 0 : i32
    return %arg0, %c0_i32 : i32, i32
  }
  func.func @transform_1(%arg0: i32) -> (i32, i32) {
    %c0_i32 = arith.constant 0 : i32
    %c0_i32_0 = arith.constant 0 : i32
    %c0_i32_1 = arith.constant 0 : i32
    return %c0_i32, %c0_i32_0 : i32, i32
  }
  func.func @transform_2(%arg0: i32) -> (i32, i32) {
    %c0_i32 = arith.constant 0 : i32
    %c0_i32_0 = arith.constant 0 : i32
    %c0_i32_1 = arith.constant 0 : i32
    return %c0_i32, %c0_i32_0 : i32, i32
  }
  func.func @transform_3(%arg0: i32) -> (i32, i32) {
    %c0_i32 = arith.constant 0 : i32
    %c0_i32_0 = arith.constant 0 : i32
    return %arg0, %c0_i32 : i32, i32
  }
}

</mosaic_0001>

<bundles_post_ra>
// kernel: a_call__.5
= control target key start
LH: loop header
LB: loop body
LE: loop exit
PB: predicated region body
PF: predicated region fallthrough
CT: control target
= control target key end

     0   :  { %s743_s12 = smov 0   ;;  %s839_s0 = inlined_call_operand.vmem [shape: bf16[512,40], index: 0, kind: input, shape index: {}]   ;;  %s840_s1 = inlined_call_operand.vmem [shape: bf16[40,256], index: 1, kind: input, shape index: {}]   ;;  %s841_s2 = inlined_call_operand.vmem [shape: f32[1,256], index: 2, kind: input, shape index: {}]   ;;  %s842_s3 = inlined_call_operand.vmem [shape: bf16[512,128], index: 3, kind: output, shape index: {}]  }
   0x1 LB: > { %s570_s13 = sadd.s32 4294967295, %s720_s12   ;;  %p574_p0 = scmp.ge.s32.totalorder %s720_s12, 1  ;;  %s720_s12 = sphi %s743_s12, %s13_s12  }
   0x2   : > { %p138_p1 = scmp.lt.s32.totalorder %s720_s12, 5 }
   0x4   : > { %p139_p2 = pnand %p574_p0, %p138_p1 }
   0x5   : > { %v698_v0 = vld [vmem:[%s840_s1 + $0x4] ss:$8 sps:$4 sm:$0xff] (!%p139_p2)   ;;  %v700_v1 = vld [vmem:[%s840_s1] ss:$8 sps:$4 sm:$0xff] (!%p139_p2)   ;;  %v722_v2 = vmov (!%p139_p2), 0   ;;  %s575_s18 = sshll.u32 (!%p139_p2), %s570_s13, 4  ;;  %v198_v17 = vlaneseq (!%p139_p2) }
   0x6   : > { %142 = sbr.rel (%p139_p2) target bundleno = 265 (0x109), region = 32  ;;  %337 = vmatprep.mubr.bf16.mxu0 (!%p139_p2), %v722_v2  ;;  %377 = vmatprep.mubr.bf16.mxu1 (!%p139_p2), %v722_v2  ;;  %v701_v3 = vld [vmem:[%s840_s1 + $0x14] ss:$8 sps:$4 sm:$0xff] (!%p139_p2)   ;;  %v195_v4 = vld [vmem:[%s840_s1 + $0x20] sm:$0xff] (!%p139_p2)  ;;  %p163_p3 = scmp.lt.s32.totalorder (!%p139_p2), %s575_s18, 63  ;;  %vm298_vm0 = vcmask (!%p139_p2), 1043456  }
   0x7   : > { %305 = vmatprep.subr.bf16.mxu0 (!%p139_p2), %v698_v0  ;;  %683 = vmatprep.subr.bf16.mxu1 (!%p139_p2), %v698_v0  ;;  %v703_v5 = vld [vmem:[%s840_s1 + $0x10] ss:$8 sps:$4 sm:$0xff] (!%p139_p2)   ;;  %v592_v6 = vcombine.high (!%p139_p2), %v195_v4, %v195_v4  ;;  %v591_v7 = vcombine.low (!%p139_p2), %v195_v4, %v195_v4  ;;  %vm273_vm1 = vcmask (!%p139_p2), 326656   ;;  %v199_v18 = vshrl.u32 (!%p139_p2), %v198_v17, 7  ;;  %v196_v20 = vld [vmem:[%s841_s2] sm:$0x3] (!%p139_p2) }
   0x8   : > { %306 = vmatpush1.bf16.msra.mxu0 (!%p139_p2), %v700_v1  ;;  %686 = vmatpush1.bf16.msra.mxu1 (!%p139_p2), %v700_v1 }
   0x9   : > { %307 = vmatprep.subr.bf16.mxu0 (!%p139_p2), %v701_v3  ;;  %684 = vmatprep.subr.bf16.mxu1 (!%p139_p2), %v701_v3  ;;  %v300_v8 = vsel (!%p139_p2), %vm298_vm0, %v591_v7, 0  ;;  %v200_v19 = vsub.s32 (!%p139_p2), 0, %v199_v18  ;;  %v204_v21 = vsub.s32 (!%p139_p2), 1, %v199_v18 }
   0xb   : > { %v785_v22 = vrot.slane (!%p139_p2), %v196_v20, %v200_v19  ;;  %v787_v23 = vrot.slane (!%p139_p2), %v196_v20, %v204_v21 }
   0xc   : > { %308 = vmatpush1.bf16.msra.mxu0 (!%p139_p2), %v703_v5  ;;  %687 = vmatpush1.bf16.msra.mxu1 (!%p139_p2), %v703_v5 }
   0xd   : > { %s844_s18 = smov (!%p163_p3, %s575_s18), 63  ;;  %593 = vmatprep.subr.msk.bf16.mxu0 %vm298_vm0, %v592_v6  ;;  %685 = vmatprep.subr.msk.bf16.mxu1 %vm298_vm0, %v592_v6 }
   0xe   : > { %s576_s25 = sshll.u32 %s844_s18, 2 }
   0xf   : > { %s166_s28 = scalar_lea.vmem %s839_s0, %s576_s25  ;;  %s802_s6 = scalar_lea.vmem %s842_s3, %s576_s25 }
  0x10   : > { %v706_v9 = vld [vmem:[%s166_s28] sm:$0xff]   ;;  %310 = vmatpush1.bf16.msra.mxu0 %v300_v8  ;;  %688 = vmatpush1.bf16.msra.mxu1 %v300_v8  ;;  %v708_v11 = vld [vmem:[%s166_s28 + $0x8] sm:$0xff]   ;;  %v710_v13 = vld [vmem:[%s166_s28 + $0x10] sm:$0xff]  }
  0x11   : > { %v707_v10 = vld [vmem:[%s166_s28 + $0x20] sm:$0xff]   ;;  %v709_v12 = vld [vmem:[%s166_s28 + $0x28] sm:$0xff]   ;;  %v711_v14 = vld [vmem:[%s166_s28 + $0x30] sm:$0xff]  }
  0x12   : > { %v712_v15 = vld [vmem:[%s166_s28 + $0x18] sm:$0xff]  }
  0x13   : > { %594 = vmatmul.mubr.msk.bf16.vlgmr.msra.gmra.mrb[0].mxu0 %vm273_vm1, %v706_v9  ;;  %598 = vmatmul.mubr.msk.bf16.vlgmr.msra.gmra.mrb[0].mxu1 %vm273_vm1, %v707_v10  ;;  %v713_v16 = vld [vmem:[%s166_s28 + $0x38] sm:$0xff]  }
  0x14   : > { %347 = vmatprep.mubr.bf16.mxu0 %v722_v2  ;;  %387 = vmatprep.mubr.bf16.mxu1 %v722_v2 }
  0x1b   : > { %595 = vmatmul.mubr.msk.bf16.gmra.mrb[4].mxu0 %vm273_vm1, %v708_v11  ;;  %599 = vmatmul.mubr.msk.bf16.gmra.mrb[4].mxu1 %vm273_vm1, %v709_v12 }
  0x1c   : > { %357 = vmatprep.mubr.bf16.mxu0 %v722_v2  ;;  %397 = vmatprep.mubr.bf16.mxu1 %v722_v2 }
  0x23   : > { %596 = vmatmul.mubr.msk.bf16.gmra.mrb[8].mxu0 %vm273_vm1, %v710_v13  ;;  %600 = vmatmul.mubr.msk.bf16.gmra.mrb[8].mxu1 %vm273_vm1, %v711_v14 }
  0x24   : > { %367 = vmatprep.mubr.bf16.mxu0 %v722_v2  ;;  %407 = vmatprep.mubr.bf16.mxu1 %v722_v2 }
  0x2b   : > { %597 = vmatmul.mubr.msk.bf16.gmra.mrb[12].mxu0 %vm273_vm1, %v712_v15  ;;  %601 = vmatmul.mubr.msk.bf16.gmra.mrb[12].mxu1 %vm273_vm1, %v713_v16 }
  0xe6   : > { %v339_v24 = vpop.f32.mrb[0].mxu0  ;;  %v379_v25 = vpop.f32.mrb[0].mxu1 }
  0xe7   : > { %v340_v26 = vadd.f32 %v339_v24, %v785_v22  ;;  %v380_v27 = vadd.f32 %v379_v25, %v785_v22  ;;  %v341_v28 = vpop.f32.mrb[1].mxu0  ;;  %v381_v29 = vpop.f32.mrb[1].mxu1 }
  0xe8   : > { %v342_v30 = vadd.f32 %v341_v28, %v787_v23  ;;  %v382_v31 = vadd.f32 %v381_v29, %v787_v23  ;;  %v343_v32 = vpop.f32.mrb[2].mxu0  ;;  %v383_v33 = vpop.f32.mrb[2].mxu1 }
  0xe9   : > { %v344_v34 = vadd.f32 %v343_v32, %v785_v22  ;;  %v384_v35 = vadd.f32 %v383_v33, %v785_v22  ;;  %v345_v36 = vpop.f32.mrb[3].mxu0  ;;  %v385_v37 = vpop.f32.mrb[3].mxu1 }
  0xea   : > { %v418_v38 = vmax.f32 %v340_v26, %v342_v30  ;;  %v426_v39 = vmax.f32 %v380_v27, %v382_v31  ;;  %v346_v40 = vadd.f32 %v345_v36, %v787_v23  ;;  %v386_v41 = vadd.f32 %v385_v37, %v787_v23 }
  0xec   : > { %v419_v42 = vmax.f32 %v344_v34, %v346_v40  ;;  %v427_v43 = vmax.f32 %v384_v35, %v386_v41 }
  0xee   : > { %v639_v44 = vpack.c.bf16 %v419_v42, %v418_v38  ;;  %v659_v45 = vpack.c.bf16 %v427_v43, %v426_v39  ;;  %v349_v46 = vpop.f32.mrb[4].mxu0  ;;  %v389_v47 = vpop.f32.mrb[4].mxu1 }
  0xef   : > { %v350_v48 = vadd.f32 %v349_v46, %v785_v22  ;;  %v390_v49 = vadd.f32 %v389_v47, %v785_v22  ;;  %v351_v50 = vpop.f32.mrb[5].mxu0  ;;  %v391_v51 = vpop.f32.mrb[5].mxu1 }
  0xf0   : > { %640 = vst [vmem:[%s802_s6] sm:$0xff] %v639_v44   ;;  %679 = vst [vmem:[%s802_s6 + $0x20] sm:$0xff] %v659_v45   ;;  %v352_v52 = vadd.f32 %v351_v50, %v787_v23  ;;  %v392_v53 = vadd.f32 %v391_v51, %v787_v23  ;;  %v353_v54 = vpop.f32.mrb[6].mxu0  ;;  %v393_v55 = vpop.f32.mrb[6].mxu1 }
  0xf1   : > { %v354_v56 = vadd.f32 %v353_v54, %v785_v22  ;;  %v394_v57 = vadd.f32 %v393_v55, %v785_v22  ;;  %v355_v58 = vpop.f32.mrb[7].mxu0  ;;  %v395_v59 = vpop.f32.mrb[7].mxu1 }
  0xf2   : > { %v420_v60 = vmax.f32 %v350_v48, %v352_v52  ;;  %v428_v61 = vmax.f32 %v390_v49, %v392_v53  ;;  %v356_v62 = vadd.f32 %v355_v58, %v787_v23  ;;  %v396_v63 = vadd.f32 %v395_v59, %v787_v23 }
  0xf4   : > { %v421_v0 = vmax.f32 %v354_v56, %v356_v62  ;;  %v429_v1 = vmax.f32 %v394_v57, %v396_v63 }
  0xf6   : > { %v644_v2 = vpack.c.bf16 %v421_v0, %v420_v60  ;;  %v664_v3 = vpack.c.bf16 %v429_v1, %v428_v61  ;;  %v359_v4 = vpop.f32.mrb[8].mxu0  ;;  %v399_v5 = vpop.f32.mrb[8].mxu1 }
  0xf7   : > { %v360_v6 = vadd.f32 %v359_v4, %v785_v22  ;;  %v400_v7 = vadd.f32 %v399_v5, %v785_v22  ;;  %v361_v8 = vpop.f32.mrb[9].mxu0  ;;  %v401_v9 = vpop.f32.mrb[9].mxu1 }
  0xf8   : > { %676 = vst [vmem:[%s802_s6 + $0x8] sm:$0xff] %v644_v2   ;;  %680 = vst [vmem:[%s802_s6 + $0x28] sm:$0xff] %v664_v3   ;;  %v362_v10 = vadd.f32 %v361_v8, %v787_v23  ;;  %v402_v11 = vadd.f32 %v401_v9, %v787_v23  ;;  %v363_v12 = vpop.f32.mrb[10].mxu0  ;;  %v403_v13 = vpop.f32.mrb[10].mxu1 }
  0xf9   : > { %v364_v14 = vadd.f32 %v363_v12, %v785_v22  ;;  %v404_v15 = vadd.f32 %v403_v13, %v785_v22  ;;  %v365_v16 = vpop.f32.mrb[11].mxu0  ;;  %v405_v17 = vpop.f32.mrb[11].mxu1 }
  0xfa   : > { %v422_v18 = vmax.f32 %v360_v6, %v362_v10  ;;  %v430_v19 = vmax.f32 %v400_v7, %v402_v11  ;;  %v366_v20 = vadd.f32 %v365_v16, %v787_v23  ;;  %v406_v21 = vadd.f32 %v405_v17, %v787_v23 }
  0xfc   : > { %v423_v24 = vmax.f32 %v364_v14, %v366_v20  ;;  %v431_v25 = vmax.f32 %v404_v15, %v406_v21 }
  0xfe   : > { %v649_v26 = vpack.c.bf16 %v423_v24, %v422_v18  ;;  %v669_v27 = vpack.c.bf16 %v431_v25, %v430_v19  ;;  %v369_v28 = vpop.f32.mrb[12].mxu0  ;;  %v409_v29 = vpop.f32.mrb[12].mxu1 }
  0xff   : > { %v370_v30 = vadd.f32 %v369_v28, %v785_v22  ;;  %v410_v31 = vadd.f32 %v409_v29, %v785_v22  ;;  %v371_v32 = vpop.f32.mrb[13].mxu0  ;;  %v411_v33 = vpop.f32.mrb[13].mxu1 }
 0x100   : > { %677 = vst [vmem:[%s802_s6 + $0x10] sm:$0xff] %v649_v26   ;;  %681 = vst [vmem:[%s802_s6 + $0x30] sm:$0xff] %v669_v27   ;;  %v372_v34 = vadd.f32 %v371_v32, %v787_v23  ;;  %v412_v35 = vadd.f32 %v411_v33, %v787_v23  ;;  %v373_v36 = vpop.f32.mrb[14].mxu0  ;;  %v413_v37 = vpop.f32.mrb[14].mxu1 }
 0x101   : > { %v374_v38 = vadd.f32 %v373_v36, %v785_v22  ;;  %v414_v39 = vadd.f32 %v413_v37, %v785_v22  ;;  %v375_v40 = vpop.f32.mrb[15].mxu0  ;;  %v415_v41 = vpop.f32.mrb[15].mxu1 }
 0x102   : > { %v424_v42 = vmax.f32 %v370_v30, %v372_v34  ;;  %v432_v43 = vmax.f32 %v410_v31, %v412_v35  ;;  %v376_v44 = vadd.f32 %v375_v40, %v787_v23  ;;  %v416_v45 = vadd.f32 %v415_v41, %v787_v23 }
 0x104   : > { %v425_v46 = vmax.f32 %v374_v38, %v376_v44  ;;  %v433_v47 = vmax.f32 %v414_v39, %v416_v45 }
 0x106   : > { %v654_v48 = vpack.c.bf16 %v425_v46, %v424_v42  ;;  %v674_v49 = vpack.c.bf16 %v433_v47, %v432_v43 }
 0x108   : > { %678 = vst [vmem:[%s802_s6 + $0x18] sm:$0xff] %v654_v48   ;;  %682 = vst [vmem:[%s802_s6 + $0x38] sm:$0xff] %v674_v49  }
 0x109 PF: > { %s13_s12 = sadd.s32 1, %s720_s12  }
 0x10a   : > { %p10_p4 = scmp.ge.s32.totalorder %s13_s12, 6  }
 0x10c   :  { %12 = sbr.rel (!%p10_p4) target bundleno = 1 (0x1), region = 62 }

// kernel: a_call__.4
= control target key start
LH: loop header
LB: loop body
LE: loop exit
PB: predicated region body
PF: predicated region fallthrough
CT: control target
= control target key end

     0   :  { %s705_s12 = smov 0   ;;  %s789_s0 = inlined_call_operand.vmem [shape: bf16[512,8], index: 0, kind: input, shape index: {}]   ;;  %s790_s1 = inlined_call_operand.vmem [shape: bf16[8,256], index: 1, kind: input, shape index: {}]   ;;  %s791_s2 = inlined_call_operand.vmem [shape: f32[1,256], index: 2, kind: input, shape index: {}]   ;;  %s792_s3 = inlined_call_operand.vmem [shape: bf16[512,128], index: 3, kind: output, shape index: {}]  }
   0x1 LB: > { %s546_s13 = sadd.s32 4294967295, %s682_s12   ;;  %p550_p0 = scmp.ge.s32.totalorder %s682_s12, 1  ;;  %s682_s12 = sphi %s705_s12, %s13_s12  }
   0x2   : > { %p138_p1 = scmp.lt.s32.totalorder %s682_s12, 5 }
   0x4   : > { %p139_p2 = pnand %p550_p0, %p138_p1 }
   0x5   : > { %v191_v0 = vld [vmem:[%s790_s1] sm:$0xff] (!%p139_p2)  ;;  %vm274_vm0 = vcmask (!%p139_p2), 1043456   ;;  %s551_s16 = sshll.u32 (!%p139_p2), %s546_s13, 4  ;;  %v684_v3 = vmov (!%p139_p2), 0   ;;  %vm249_vm1 = vcmask (!%p139_p2), 64512   ;;  %v194_v13 = vlaneseq (!%p139_p2) }
   0x6   : > { %142 = sbr.rel (%p139_p2) target bundleno = 264 (0x108), region = 32  ;;  %v564_v1 = vcombine.high (!%p139_p2), %v191_v0, %v191_v0  ;;  %v563_v2 = vcombine.low (!%p139_p2), %v191_v0, %v191_v0  ;;  %313 = vmatprep.mubr.bf16.mxu0 (!%p139_p2), %v684_v3  ;;  %353 = vmatprep.mubr.bf16.mxu1 (!%p139_p2), %v684_v3  ;;  %p163_p3 = scmp.lt.s32.totalorder (!%p139_p2), %s551_s16, 63  ;;  %v192_v16 = vld [vmem:[%s791_s2] sm:$0x3] (!%p139_p2) }
   0x7   : > { %v195_v14 = vshrl.u32 (!%p139_p2), %v194_v13, 7 }
   0x8   : > { %565 = vmatprep.subr.msk.bf16.mxu0 (!%p139_p2), %vm274_vm0, %v564_v1  ;;  %655 = vmatprep.subr.msk.bf16.mxu1 (!%p139_p2), %vm274_vm0, %v564_v1  ;;  %v276_v4 = vsel (!%p139_p2), %vm274_vm0, %v563_v2, 0 }
   0x9   : > { %282 = vmatpush1.bf16.msra.mxu0 (!%p139_p2), %v276_v4  ;;  %656 = vmatpush1.bf16.msra.mxu1 (!%p139_p2), %v276_v4  ;;  %v196_v15 = vsub.s32 (!%p139_p2), 0, %v195_v14  ;;  %v200_v17 = vsub.s32 (!%p139_p2), 1, %v195_v14 }
   0xb   : > { %v735_v18 = vrot.slane (!%p139_p2), %v192_v16, %v196_v15  ;;  %v737_v19 = vrot.slane (!%p139_p2), %v192_v16, %v200_v17 }
   0xd   : > { %s794_s16 = smov (!%p163_p3, %s551_s16), 63 }
   0xe   : > { %s552_s17 = sshll.u32 %s794_s16, 2 }
   0xf   : > { %s166_s20 = scalar_lea.vmem %s789_s0, %s552_s17  ;;  %s752_s25 = scalar_lea.vmem %s792_s3, %s552_s17 }
  0x10   : > { %v668_v5 = vld [vmem:[%s166_s20] sm:$0xff]   ;;  %v670_v7 = vld [vmem:[%s166_s20 + $0x8] sm:$0xff]   ;;  %v672_v9 = vld [vmem:[%s166_s20 + $0x10] sm:$0xff]  }
  0x11   : > { %v669_v6 = vld [vmem:[%s166_s20 + $0x20] sm:$0xff]   ;;  %566 = vmatmul.mubr.msk.bf16.vlgmr.msra.gmra.mrb[0].mxu0 %vm249_vm1, %v668_v5  ;;  %v671_v8 = vld [vmem:[%s166_s20 + $0x28] sm:$0xff]   ;;  %v673_v10 = vld [vmem:[%s166_s20 + $0x30] sm:$0xff]  }
  0x12   : > { %570 = vmatmul.mubr.msk.bf16.vlgmr.msra.gmra.mrb[0].mxu1 %vm249_vm1, %v669_v6  ;;  %323 = vmatprep.mubr.bf16.mxu0 %v684_v3  ;;  %v674_v11 = vld [vmem:[%s166_s20 + $0x18] sm:$0xff]  }
  0x13   : > { %363 = vmatprep.mubr.bf16.mxu1 %v684_v3  ;;  %v675_v12 = vld [vmem:[%s166_s20 + $0x38] sm:$0xff]  }
  0x19   : > { %567 = vmatmul.mubr.msk.bf16.gmra.mrb[4].mxu0 %vm249_vm1, %v670_v7 }
  0x1a   : > { %571 = vmatmul.mubr.msk.bf16.gmra.mrb[4].mxu1 %vm249_vm1, %v671_v8  ;;  %333 = vmatprep.mubr.bf16.mxu0 %v684_v3 }
  0x1b   : > { %373 = vmatprep.mubr.bf16.mxu1 %v684_v3 }
  0x21   : > { %568 = vmatmul.mubr.msk.bf16.gmra.mrb[8].mxu0 %vm249_vm1, %v672_v9 }
  0x22   : > { %572 = vmatmul.mubr.msk.bf16.gmra.mrb[8].mxu1 %vm249_vm1, %v673_v10  ;;  %343 = vmatprep.mubr.bf16.mxu0 %v684_v3 }
  0x23   : > { %383 = vmatprep.mubr.bf16.mxu1 %v684_v3 }
  0x29   : > { %569 = vmatmul.mubr.msk.bf16.gmra.mrb[12].mxu0 %vm249_vm1, %v674_v11 }
  0x2a   : > { %573 = vmatmul.mubr.msk.bf16.gmra.mrb[12].mxu1 %vm249_vm1, %v675_v12 }
  0xe4   : > { %v315_v20 = vpop.f32.mrb[0].mxu0 }
  0xe5   : > { %v316_v21 = vadd.f32 %v315_v20, %v735_v18  ;;  %v355_v22 = vpop.f32.mrb[0].mxu1  ;;  %v317_v23 = vpop.f32.mrb[1].mxu0 }
  0xe6   : > { %v356_v24 = vadd.f32 %v355_v22, %v735_v18  ;;  %v318_v25 = vadd.f32 %v317_v23, %v737_v19  ;;  %v357_v26 = vpop.f32.mrb[1].mxu1  ;;  %v319_v27 = vpop.f32.mrb[2].mxu0 }
  0xe7   : > { %v358_v28 = vadd.f32 %v357_v26, %v737_v19  ;;  %v320_v29 = vadd.f32 %v319_v27, %v735_v18  ;;  %v359_v30 = vpop.f32.mrb[2].mxu1  ;;  %v321_v31 = vpop.f32.mrb[3].mxu0 }
  0xe8   : > { %v394_v32 = vmax.f32 %v316_v21, %v318_v25  ;;  %v360_v33 = vadd.f32 %v359_v30, %v735_v18  ;;  %v322_v34 = vadd.f32 %v321_v31, %v737_v19  ;;  %v361_v35 = vpop.f32.mrb[3].mxu1 }
  0xe9   : > { %v402_v36 = vmax.f32 %v356_v24, %v358_v28  ;;  %v362_v37 = vadd.f32 %v361_v35, %v737_v19 }
  0xea   : > { %v395_v38 = vmax.f32 %v320_v29, %v322_v34 }
  0xeb   : > { %v403_v39 = vmax.f32 %v360_v33, %v362_v37 }
  0xec   : > { %v611_v40 = vpack.c.bf16 %v395_v38, %v394_v32  ;;  %v325_v41 = vpop.f32.mrb[4].mxu0 }
  0xed   : > { %v631_v42 = vpack.c.bf16 %v403_v39, %v402_v36  ;;  %v326_v43 = vadd.f32 %v325_v41, %v735_v18  ;;  %v365_v44 = vpop.f32.mrb[4].mxu1  ;;  %v327_v45 = vpop.f32.mrb[5].mxu0 }
  0xee   : > { %612 = vst [vmem:[%s752_s25] sm:$0xff] %v611_v40   ;;  %v366_v46 = vadd.f32 %v365_v44, %v735_v18  ;;  %v328_v47 = vadd.f32 %v327_v45, %v737_v19  ;;  %v367_v48 = vpop.f32.mrb[5].mxu1  ;;  %v329_v49 = vpop.f32.mrb[6].mxu0 }
  0xef   : > { %651 = vst [vmem:[%s752_s25 + $0x20] sm:$0xff] %v631_v42   ;;  %v368_v50 = vadd.f32 %v367_v48, %v737_v19  ;;  %v330_v51 = vadd.f32 %v329_v49, %v735_v18  ;;  %v369_v52 = vpop.f32.mrb[6].mxu1  ;;  %v331_v53 = vpop.f32.mrb[7].mxu0 }
  0xf0   : > { %v396_v54 = vmax.f32 %v326_v43, %v328_v47  ;;  %v370_v55 = vadd.f32 %v369_v52, %v735_v18  ;;  %v332_v56 = vadd.f32 %v331_v53, %v737_v19  ;;  %v371_v57 = vpop.f32.mrb[7].mxu1 }
  0xf1   : > { %v404_v58 = vmax.f32 %v366_v46, %v368_v50  ;;  %v372_v59 = vadd.f32 %v371_v57, %v737_v19 }
  0xf2   : > { %v397_v60 = vmax.f32 %v330_v51, %v332_v56 }
  0xf3   : > { %v405_v61 = vmax.f32 %v370_v55, %v372_v59 }
  0xf4   : > { %v616_v62 = vpack.c.bf16 %v397_v60, %v396_v54  ;;  %v335_v63 = vpop.f32.mrb[8].mxu0 }
  0xf5   : > { %v636_v0 = vpack.c.bf16 %v405_v61, %v404_v58  ;;  %v336_v1 = vadd.f32 %v335_v63, %v735_v18  ;;  %v375_v2 = vpop.f32.mrb[8].mxu1  ;;  %v337_v3 = vpop.f32.mrb[9].mxu0 }
  0xf6   : > { %648 = vst [vmem:[%s752_s25 + $0x8] sm:$0xff] %v616_v62   ;;  %v376_v4 = vadd.f32 %v375_v2, %v735_v18  ;;  %v338_v5 = vadd.f32 %v337_v3, %v737_v19  ;;  %v377_v6 = vpop.f32.mrb[9].mxu1  ;;  %v339_v7 = vpop.f32.mrb[10].mxu0 }
  0xf7   : > { %652 = vst [vmem:[%s752_s25 + $0x28] sm:$0xff] %v636_v0   ;;  %v378_v8 = vadd.f32 %v377_v6, %v737_v19  ;;  %v340_v9 = vadd.f32 %v339_v7, %v735_v18  ;;  %v379_v10 = vpop.f32.mrb[10].mxu1  ;;  %v341_v11 = vpop.f32.mrb[11].mxu0 }
  0xf8   : > { %v398_v12 = vmax.f32 %v336_v1, %v338_v5  ;;  %v380_v13 = vadd.f32 %v379_v10, %v735_v18  ;;  %v342_v14 = vadd.f32 %v341_v11, %v737_v19  ;;  %v381_v15 = vpop.f32.mrb[11].mxu1 }
  0xf9   : > { %v406_v16 = vmax.f32 %v376_v4, %v378_v8  ;;  %v382_v17 = vadd.f32 %v381_v15, %v737_v19 }
  0xfa   : > { %v399_v20 = vmax.f32 %v340_v9, %v342_v14 }
  0xfb   : > { %v407_v21 = vmax.f32 %v380_v13, %v382_v17 }
  0xfc   : > { %v621_v22 = vpack.c.bf16 %v399_v20, %v398_v12  ;;  %v345_v23 = vpop.f32.mrb[12].mxu0 }
  0xfd   : > { %v641_v24 = vpack.c.bf16 %v407_v21, %v406_v16  ;;  %v346_v25 = vadd.f32 %v345_v23, %v735_v18  ;;  %v385_v26 = vpop.f32.mrb[12].mxu1  ;;  %v347_v27 = vpop.f32.mrb[13].mxu0 }
  0xfe   : > { %649 = vst [vmem:[%s752_s25 + $0x10] sm:$0xff] %v621_v22   ;;  %v386_v28 = vadd.f32 %v385_v26, %v735_v18  ;;  %v348_v29 = vadd.f32 %v347_v27, %v737_v19  ;;  %v387_v30 = vpop.f32.mrb[13].mxu1  ;;  %v349_v31 = vpop.f32.mrb[14].mxu0 }
  0xff   : > { %653 = vst [vmem:[%s752_s25 + $0x30] sm:$0xff] %v641_v24   ;;  %v388_v32 = vadd.f32 %v387_v30, %v737_v19  ;;  %v350_v33 = vadd.f32 %v349_v31, %v735_v18  ;;  %v389_v34 = vpop.f32.mrb[14].mxu1  ;;  %v351_v35 = vpop.f32.mrb[15].mxu0 }
 0x100   : > { %v400_v36 = vmax.f32 %v346_v25, %v348_v29  ;;  %v390_v37 = vadd.f32 %v389_v34, %v735_v18  ;;  %v352_v38 = vadd.f32 %v351_v35, %v737_v19  ;;  %v391_v39 = vpop.f32.mrb[15].mxu1 }
 0x101   : > { %v408_v40 = vmax.f32 %v386_v28, %v388_v32  ;;  %v392_v41 = vadd.f32 %v391_v39, %v737_v19 }
 0x102   : > { %v401_v42 = vmax.f32 %v350_v33, %v352_v38 }
 0x103   : > { %v409_v43 = vmax.f32 %v390_v37, %v392_v41 }
 0x104   : > { %v626_v44 = vpack.c.bf16 %v401_v42, %v400_v36 }
 0x105   : > { %v646_v45 = vpack.c.bf16 %v409_v43, %v408_v40 }
 0x106   : > { %650 = vst [vmem:[%s752_s25 + $0x18] sm:$0xff] %v626_v44  }
 0x107   : > { %654 = vst [vmem:[%s752_s25 + $0x38] sm:$0xff] %v646_v45  }
 0x108 PF: > { %s13_s12 = sadd.s32 1, %s682_s12  }
 0x109   : > { %p10_p4 = scmp.ge.s32.totalorder %s13_s12, 6  }
 0x10b   :  { %12 = sbr.rel (!%p10_p4) target bundleno = 1 (0x1), region = 62 }

// kernel: a_call__.6
= control target key start
LH: loop header
LB: loop body
LE: loop exit
PB: predicated region body
PF: predicated region fallthrough
CT: control target
= control target key end

     0   :  { %s812_s12 = smov 0   ;;  %s951_s0 = inlined_call_operand.vmem [shape: bf16[512,128], index: 0, kind: input, shape index: {}]   ;;  %s952_s1 = inlined_call_operand.vmem [shape: bf16[128,256], index: 1, kind: input, shape index: {}]   ;;  %s953_s2 = inlined_call_operand.vmem [shape: f32[1,256], index: 2, kind: input, shape index: {}]   ;;  %s954_s3 = inlined_call_operand.vmem [shape: bf16[512,128], index: 3, kind: output, shape index: {}]  }
   0x1 LB: > { %s612_s13 = sadd.s32 4294967295, %s789_s12   ;;  %p616_p0 = scmp.ge.s32.totalorder %s789_s12, 1  ;;  %s789_s12 = sphi %s812_s12, %s13_s12  }
   0x2   : > { %p138_p1 = scmp.lt.s32.totalorder %s789_s12, 5 }
   0x4   : > { %p139_p2 = pnand %p616_p0, %p138_p1 }
   0x5   : > { %v751_v0 = vld [vmem:[%s952_s1 + $0x4] ss:$8 sps:$4 sm:$0xff] (!%p139_p2)   ;;  %s617_s16 = sshll.u32 (!%p139_p2), %s612_s13, 4  ;;  %v753_v1 = vld [vmem:[%s952_s1] ss:$8 sps:$4 sm:$0xff] (!%p139_p2)   ;;  %v791_v2 = vmov (!%p139_p2), 0   ;;  %v209_v25 = vlaneseq (!%p139_p2) }
   0x6   : > { %142 = sbr.rel (%p139_p2) target bundleno = 285 (0x11d), region = 32  ;;  %379 = vmatprep.mubr.bf16.mxu0 (!%p139_p2), %v791_v2  ;;  %419 = vmatprep.mubr.bf16.mxu1 (!%p139_p2), %v791_v2  ;;  %p163_p3 = scmp.lt.s32.totalorder (!%p139_p2), %s617_s16, 63  ;;  %v754_v3 = vld [vmem:[%s952_s1 + $0x14] ss:$8 sps:$4 sm:$0xff] (!%p139_p2)   ;;  %v756_v4 = vld [vmem:[%s952_s1 + $0x10] ss:$8 sps:$4 sm:$0xff] (!%p139_p2)  }
   0x7   : > { %347 = vmatprep.subr.bf16.mxu0 (!%p139_p2), %v751_v0  ;;  %726 = vmatprep.subr.bf16.mxu1 (!%p139_p2), %v751_v0  ;;  %v757_v5 = vld [vmem:[%s952_s1 + $0x24] ss:$8 sps:$4 sm:$0xff] (!%p139_p2)   ;;  %v759_v6 = vld [vmem:[%s952_s1 + $0x20] ss:$8 sps:$4 sm:$0xff] (!%p139_p2)   ;;  %v760_v7 = vld [vmem:[%s952_s1 + $0x34] ss:$8 sps:$4 sm:$0xff] (!%p139_p2)  }
   0x8   : > { %348 = vmatpush1.bf16.msra.mxu0 (!%p139_p2), %v753_v1  ;;  %734 = vmatpush1.bf16.msra.mxu1 (!%p139_p2), %v753_v1  ;;  %v762_v8 = vld [vmem:[%s952_s1 + $0x30] ss:$8 sps:$4 sm:$0xff] (!%p139_p2)   ;;  %v763_v9 = vld [vmem:[%s952_s1 + $0x44] ss:$8 sps:$4 sm:$0xff] (!%p139_p2)   ;;  %v765_v10 = vld [vmem:[%s952_s1 + $0x40] ss:$8 sps:$4 sm:$0xff] (!%p139_p2)  }
   0x9   : > { %349 = vmatprep.subr.bf16.mxu0 (!%p139_p2), %v754_v3  ;;  %727 = vmatprep.subr.bf16.mxu1 (!%p139_p2), %v754_v3  ;;  %v766_v11 = vld [vmem:[%s952_s1 + $0x54] ss:$8 sps:$4 sm:$0xff] (!%p139_p2)   ;;  %v768_v12 = vld [vmem:[%s952_s1 + $0x50] ss:$8 sps:$4 sm:$0xff] (!%p139_p2)   ;;  %v769_v13 = vld [vmem:[%s952_s1 + $0x64] ss:$8 sps:$4 sm:$0xff] (!%p139_p2)  }
   0xa   : > { %v771_v14 = vld [vmem:[%s952_s1 + $0x60] ss:$8 sps:$4 sm:$0xff] (!%p139_p2)   ;;  %v772_v15 = vld [vmem:[%s952_s1 + $0x74] ss:$8 sps:$4 sm:$0xff] (!%p139_p2)   ;;  %v774_v16 = vld [vmem:[%s952_s1 + $0x70] ss:$8 sps:$4 sm:$0xff] (!%p139_p2)  }
   0xb   : > { %v210_v26 = vshrl.u32 (!%p139_p2), %v209_v25, 7  ;;  %v207_v28 = vld [vmem:[%s953_s2] sm:$0x3] (!%p139_p2) }
   0xc   : > { %350 = vmatpush1.bf16.msra.mxu0 (!%p139_p2), %v756_v4  ;;  %735 = vmatpush1.bf16.msra.mxu1 (!%p139_p2), %v756_v4 }
   0xd   : > { %s956_s16 = smov (!%p163_p3, %s617_s16), 63  ;;  %351 = vmatprep.subr.bf16.mxu0 %v757_v5  ;;  %728 = vmatprep.subr.bf16.mxu1 %v757_v5  ;;  %v211_v27 = vsub.s32 0, %v210_v26  ;;  %v215_v29 = vsub.s32 1, %v210_v26 }
   0xe   : > { %s618_s25 = sshll.u32 %s956_s16, 2 }
   0xf   : > { %s851_s5 = scalar_lea.vmem %s951_s0, %s618_s25  ;;  %v897_v30 = vrot.slane %v207_v28, %v211_v27  ;;  %v899_v31 = vrot.slane %v207_v28, %v215_v29  ;;  %s914_s4 = scalar_lea.vmem %s954_s3, %s618_s25 }
  0x10   : > { %352 = vmatpush1.bf16.msra.mxu0 %v759_v6  ;;  %736 = vmatpush1.bf16.msra.mxu1 %v759_v6  ;;  %v775_v17 = vld [vmem:[%s851_s5] sm:$0xff]   ;;  %v777_v19 = vld [vmem:[%s851_s5 + $0x8] sm:$0xff]   ;;  %v779_v21 = vld [vmem:[%s851_s5 + $0x10] sm:$0xff]  }
  0x11   : > { %353 = vmatprep.subr.bf16.mxu0 %v760_v7  ;;  %729 = vmatprep.subr.bf16.mxu1 %v760_v7  ;;  %v776_v18 = vld [vmem:[%s851_s5 + $0x20] sm:$0xff]   ;;  %v778_v20 = vld [vmem:[%s851_s5 + $0x28] sm:$0xff]   ;;  %v780_v22 = vld [vmem:[%s851_s5 + $0x30] sm:$0xff]  }
  0x12   : > { %v781_v23 = vld [vmem:[%s851_s5 + $0x18] sm:$0xff]  }
  0x13   : > { %v782_v24 = vld [vmem:[%s851_s5 + $0x38] sm:$0xff]  }
  0x14   : > { %354 = vmatpush1.bf16.msra.mxu0 %v762_v8  ;;  %737 = vmatpush1.bf16.msra.mxu1 %v762_v8 }
  0x15   : > { %355 = vmatprep.subr.bf16.mxu0 %v763_v9  ;;  %730 = vmatprep.subr.bf16.mxu1 %v763_v9 }
  0x18   : > { %356 = vmatpush1.bf16.msra.mxu0 %v765_v10  ;;  %738 = vmatpush1.bf16.msra.mxu1 %v765_v10 }
  0x19   : > { %357 = vmatprep.subr.bf16.mxu0 %v766_v11  ;;  %731 = vmatprep.subr.bf16.mxu1 %v766_v11 }
  0x1c   : > { %358 = vmatpush1.bf16.msra.mxu0 %v768_v12  ;;  %739 = vmatpush1.bf16.msra.mxu1 %v768_v12 }
  0x1d   : > { %359 = vmatprep.subr.bf16.mxu0 %v769_v13  ;;  %732 = vmatprep.subr.bf16.mxu1 %v769_v13 }
  0x20   : > { %360 = vmatpush1.bf16.msra.mxu0 %v771_v14  ;;  %740 = vmatpush1.bf16.msra.mxu1 %v771_v14 }
  0x21   : > { %361 = vmatprep.subr.bf16.mxu0 %v772_v15  ;;  %733 = vmatprep.subr.bf16.mxu1 %v772_v15 }
  0x24   : > { %362 = vmatpush1.bf16.msra.mxu0 %v774_v16  ;;  %741 = vmatpush1.bf16.msra.mxu1 %v774_v16 }
  0x27   : > { %380 = vmatmul.mubr.bf16.vlgmr.msra.gmra.mrb[0].mxu0 %v775_v17  ;;  %420 = vmatmul.mubr.bf16.vlgmr.msra.gmra.mrb[0].mxu1 %v776_v18 }
  0x28   : > { %389 = vmatprep.mubr.bf16.mxu0 %v791_v2  ;;  %429 = vmatprep.mubr.bf16.mxu1 %v791_v2 }
  0x2f   : > { %390 = vmatmul.mubr.bf16.gmra.mrb[4].mxu0 %v777_v19  ;;  %430 = vmatmul.mubr.bf16.gmra.mrb[4].mxu1 %v778_v20 }
  0x30   : > { %399 = vmatprep.mubr.bf16.mxu0 %v791_v2  ;;  %439 = vmatprep.mubr.bf16.mxu1 %v791_v2 }
  0x37   : > { %400 = vmatmul.mubr.bf16.gmra.mrb[8].mxu0 %v779_v21  ;;  %440 = vmatmul.mubr.bf16.gmra.mrb[8].mxu1 %v780_v22 }
  0x38   : > { %409 = vmatprep.mubr.bf16.mxu0 %v791_v2  ;;  %449 = vmatprep.mubr.bf16.mxu1 %v791_v2 }
  0x3f   : > { %410 = vmatmul.mubr.bf16.gmra.mrb[12].mxu0 %v781_v23  ;;  %450 = vmatmul.mubr.bf16.gmra.mrb[12].mxu1 %v782_v24 }
  0xfa   : > { %v381_v32 = vpop.f32.mrb[0].mxu0  ;;  %v421_v33 = vpop.f32.mrb[0].mxu1 }
  0xfb   : > { %v382_v34 = vadd.f32 %v381_v32, %v897_v30  ;;  %v422_v35 = vadd.f32 %v421_v33, %v897_v30  ;;  %v383_v36 = vpop.f32.mrb[1].mxu0  ;;  %v423_v37 = vpop.f32.mrb[1].mxu1 }
  0xfc   : > { %v384_v38 = vadd.f32 %v383_v36, %v899_v31  ;;  %v424_v39 = vadd.f32 %v423_v37, %v899_v31  ;;  %v385_v40 = vpop.f32.mrb[2].mxu0  ;;  %v425_v41 = vpop.f32.mrb[2].mxu1 }
  0xfd   : > { %v386_v42 = vadd.f32 %v385_v40, %v897_v30  ;;  %v426_v43 = vadd.f32 %v425_v41, %v897_v30  ;;  %v387_v44 = vpop.f32.mrb[3].mxu0  ;;  %v427_v45 = vpop.f32.mrb[3].mxu1 }
  0xfe   : > { %v460_v46 = vmax.f32 %v382_v34, %v384_v38  ;;  %v468_v47 = vmax.f32 %v422_v35, %v424_v39  ;;  %v388_v48 = vadd.f32 %v387_v44, %v899_v31  ;;  %v428_v49 = vadd.f32 %v427_v45, %v899_v31 }
 0x100   : > { %v461_v50 = vmax.f32 %v386_v42, %v388_v48  ;;  %v469_v51 = vmax.f32 %v426_v43, %v428_v49 }
 0x102   : > { %v682_v52 = vpack.c.bf16 %v461_v50, %v460_v46  ;;  %v702_v53 = vpack.c.bf16 %v469_v51, %v468_v47  ;;  %v391_v54 = vpop.f32.mrb[4].mxu0  ;;  %v431_v55 = vpop.f32.mrb[4].mxu1 }
 0x103   : > { %v392_v56 = vadd.f32 %v391_v54, %v897_v30  ;;  %v432_v57 = vadd.f32 %v431_v55, %v897_v30  ;;  %v393_v58 = vpop.f32.mrb[5].mxu0  ;;  %v433_v59 = vpop.f32.mrb[5].mxu1 }
 0x104   : > { %683 = vst [vmem:[%s914_s4] sm:$0xff] %v682_v52   ;;  %722 = vst [vmem:[%s914_s4 + $0x20] sm:$0xff] %v702_v53   ;;  %v394_v60 = vadd.f32 %v393_v58, %v899_v31  ;;  %v434_v61 = vadd.f32 %v433_v59, %v899_v31  ;;  %v395_v62 = vpop.f32.mrb[6].mxu0  ;;  %v435_v63 = vpop.f32.mrb[6].mxu1 }
 0x105   : > { %v396_v0 = vadd.f32 %v395_v62, %v897_v30  ;;  %v436_v1 = vadd.f32 %v435_v63, %v897_v30  ;;  %v397_v2 = vpop.f32.mrb[7].mxu0  ;;  %v437_v3 = vpop.f32.mrb[7].mxu1 }
 0x106   : > { %v462_v4 = vmax.f32 %v392_v56, %v394_v60  ;;  %v470_v5 = vmax.f32 %v432_v57, %v434_v61  ;;  %v398_v6 = vadd.f32 %v397_v2, %v899_v31  ;;  %v438_v7 = vadd.f32 %v437_v3, %v899_v31 }
 0x108   : > { %v463_v8 = vmax.f32 %v396_v0, %v398_v6  ;;  %v471_v9 = vmax.f32 %v436_v1, %v438_v7 }
 0x10a   : > { %v687_v10 = vpack.c.bf16 %v463_v8, %v462_v4  ;;  %v707_v11 = vpack.c.bf16 %v471_v9, %v470_v5  ;;  %v401_v12 = vpop.f32.mrb[8].mxu0  ;;  %v441_v13 = vpop.f32.mrb[8].mxu1 }
 0x10b   : > { %v402_v14 = vadd.f32 %v401_v12, %v897_v30  ;;  %v442_v15 = vadd.f32 %v441_v13, %v897_v30  ;;  %v403_v16 = vpop.f32.mrb[9].mxu0  ;;  %v443_v17 = vpop.f32.mrb[9].mxu1 }
 0x10c   : > { %719 = vst [vmem:[%s914_s4 + $0x8] sm:$0xff] %v687_v10   ;;  %723 = vst [vmem:[%s914_s4 + $0x28] sm:$0xff] %v707_v11   ;;  %v404_v18 = vadd.f32 %v403_v16, %v899_v31  ;;  %v444_v19 = vadd.f32 %v443_v17, %v899_v31  ;;  %v405_v20 = vpop.f32.mrb[10].mxu0  ;;  %v445_v21 = vpop.f32.mrb[10].mxu1 }
 0x10d   : > { %v406_v22 = vadd.f32 %v405_v20, %v897_v30  ;;  %v446_v23 = vadd.f32 %v445_v21, %v897_v30  ;;  %v407_v24 = vpop.f32.mrb[11].mxu0  ;;  %v447_v25 = vpop.f32.mrb[11].mxu1 }
 0x10e   : > { %v464_v26 = vmax.f32 %v402_v14, %v404_v18  ;;  %v472_v27 = vmax.f32 %v442_v15, %v444_v19  ;;  %v408_v28 = vadd.f32 %v407_v24, %v899_v31  ;;  %v448_v29 = vadd.f32 %v447_v25, %v899_v31 }
 0x110   : > { %v465_v32 = vmax.f32 %v406_v22, %v408_v28  ;;  %v473_v33 = vmax.f32 %v446_v23, %v448_v29 }
 0x112   : > { %v692_v34 = vpack.c.bf16 %v465_v32, %v464_v26  ;;  %v712_v35 = vpack.c.bf16 %v473_v33, %v472_v27  ;;  %v411_v36 = vpop.f32.mrb[12].mxu0  ;;  %v451_v37 = vpop.f32.mrb[12].mxu1 }
 0x113   : > { %v412_v38 = vadd.f32 %v411_v36, %v897_v30  ;;  %v452_v39 = vadd.f32 %v451_v37, %v897_v30  ;;  %v413_v40 = vpop.f32.mrb[13].mxu0  ;;  %v453_v41 = vpop.f32.mrb[13].mxu1 }
 0x114   : > { %720 = vst [vmem:[%s914_s4 + $0x10] sm:$0xff] %v692_v34   ;;  %724 = vst [vmem:[%s914_s4 + $0x30] sm:$0xff] %v712_v35   ;;  %v414_v42 = vadd.f32 %v413_v40, %v899_v31  ;;  %v454_v43 = vadd.f32 %v453_v41, %v899_v31  ;;  %v415_v44 = vpop.f32.mrb[14].mxu0  ;;  %v455_v45 = vpop.f32.mrb[14].mxu1 }
 0x115   : > { %v416_v46 = vadd.f32 %v415_v44, %v897_v30  ;;  %v456_v47 = vadd.f32 %v455_v45, %v897_v30  ;;  %v417_v48 = vpop.f32.mrb[15].mxu0  ;;  %v457_v49 = vpop.f32.mrb[15].mxu1 }
 0x116   : > { %v466_v50 = vmax.f32 %v412_v38, %v414_v42  ;;  %v474_v51 = vmax.f32 %v452_v39, %v454_v43  ;;  %v418_v52 = vadd.f32 %v417_v48, %v899_v31  ;;  %v458_v53 = vadd.f32 %v457_v49, %v899_v31 }
 0x118   : > { %v467_v54 = vmax.f32 %v416_v46, %v418_v52  ;;  %v475_v55 = vmax.f32 %v456_v47, %v458_v53 }
 0x11a   : > { %v697_v56 = vpack.c.bf16 %v467_v54, %v466_v50  ;;  %v717_v57 = vpack.c.bf16 %v475_v55, %v474_v51 }
 0x11c   : > { %721 = vst [vmem:[%s914_s4 + $0x18] sm:$0xff] %v697_v56   ;;  %725 = vst [vmem:[%s914_s4 + $0x38] sm:$0xff] %v717_v57  }
 0x11d PF: > { %s13_s12 = sadd.s32 1, %s789_s12  }
 0x11e   : > { %p10_p4 = scmp.ge.s32.totalorder %s13_s12, 6  }
 0x120   :  { %12 = sbr.rel (!%p10_p4) target bundleno = 1 (0x1), region = 62 }

// kernel: a_call__.7
= control target key start
LH: loop header
LB: loop body
LE: loop exit
PB: predicated region body
PF: predicated region fallthrough
CT: control target
= control target key end

     0   :  { %s781_s12 = smov 0   ;;  %s899_s0 = inlined_call_operand.vmem [shape: bf16[512,72], index: 0, kind: input, shape index: {}]   ;;  %s900_s1 = inlined_call_operand.vmem [shape: bf16[72,256], index: 1, kind: input, shape index: {}]   ;;  %s901_s2 = inlined_call_operand.vmem [shape: f32[1,256], index: 2, kind: input, shape index: {}]   ;;  %s902_s3 = inlined_call_operand.vmem [shape: bf16[512,128], index: 3, kind: output, shape index: {}]  }
   0x1 LB: > { %s594_s13 = sadd.s32 4294967295, %s758_s12   ;;  %p598_p0 = scmp.ge.s32.totalorder %s758_s12, 1  ;;  %s758_s12 = sphi %s781_s12, %s13_s12  }
   0x2   : > { %p138_p1 = scmp.lt.s32.totalorder %s758_s12, 5 }
   0x4   : > { %p139_p2 = pnand %p598_p0, %p138_p1 }
   0x5   : > { %v730_v0 = vld [vmem:[%s900_s1 + $0x4] ss:$8 sps:$4 sm:$0xff] (!%p139_p2)   ;;  %v732_v1 = vld [vmem:[%s900_s1] ss:$8 sps:$4 sm:$0xff] (!%p139_p2)   ;;  %v760_v2 = vmov (!%p139_p2), 0   ;;  %s599_s18 = sshll.u32 (!%p139_p2), %s594_s13, 4  ;;  %v202_v21 = vlaneseq (!%p139_p2) }
   0x6   : > { %142 = sbr.rel (%p139_p2) target bundleno = 273 (0x111), region = 32  ;;  %361 = vmatprep.mubr.bf16.mxu0 (!%p139_p2), %v760_v2  ;;  %401 = vmatprep.mubr.bf16.mxu1 (!%p139_p2), %v760_v2  ;;  %v733_v3 = vld [vmem:[%s900_s1 + $0x14] ss:$8 sps:$4 sm:$0xff] (!%p139_p2)   ;;  %p163_p3 = scmp.lt.s32.totalorder (!%p139_p2), %s599_s18, 63  ;;  %v735_v4 = vld [vmem:[%s900_s1 + $0x10] ss:$8 sps:$4 sm:$0xff] (!%p139_p2)  }
   0x7   : > { %329 = vmatprep.subr.bf16.mxu0 (!%p139_p2), %v730_v0  ;;  %711 = vmatprep.subr.bf16.mxu1 (!%p139_p2), %v730_v0  ;;  %v736_v5 = vld [vmem:[%s900_s1 + $0x24] ss:$8 sps:$4 sm:$0xff] (!%p139_p2)   ;;  %v738_v6 = vld [vmem:[%s900_s1 + $0x20] ss:$8 sps:$4 sm:$0xff] (!%p139_p2)   ;;  %v739_v7 = vld [vmem:[%s900_s1 + $0x34] ss:$8 sps:$4 sm:$0xff] (!%p139_p2)  }
   0x8   : > { %330 = vmatpush1.bf16.msra.mxu0 (!%p139_p2), %v732_v1  ;;  %716 = vmatpush1.bf16.msra.mxu1 (!%p139_p2), %v732_v1  ;;  %v199_v8 = vld [vmem:[%s900_s1 + $0x40] sm:$0xff] (!%p139_p2)  ;;  %v741_v9 = vld [vmem:[%s900_s1 + $0x30] ss:$8 sps:$4 sm:$0xff] (!%p139_p2)   ;;  %vm322_vm0 = vcmask (!%p139_p2), 1043456   ;;  %vm297_vm1 = vcmask (!%p139_p2), 588800   ;;  %v203_v22 = vshrl.u32 (!%p139_p2), %v202_v21, 7 }
   0x9   : > { %331 = vmatprep.subr.bf16.mxu0 (!%p139_p2), %v733_v3  ;;  %712 = vmatprep.subr.bf16.mxu1 (!%p139_p2), %v733_v3  ;;  %v620_v10 = vcombine.high (!%p139_p2), %v199_v8, %v199_v8  ;;  %v619_v11 = vcombine.low (!%p139_p2), %v199_v8, %v199_v8  ;;  %v200_v24 = vld [vmem:[%s901_s2] sm:$0x3] (!%p139_p2) }
   0xa   : > { %v204_v23 = vsub.s32 (!%p139_p2), 0, %v203_v22  ;;  %v208_v25 = vsub.s32 (!%p139_p2), 1, %v203_v22 }
   0xb   : > { %v324_v12 = vsel (!%p139_p2), %vm322_vm0, %v619_v11, 0 }
   0xc   : > { %332 = vmatpush1.bf16.msra.mxu0 (!%p139_p2), %v735_v4  ;;  %717 = vmatpush1.bf16.msra.mxu1 (!%p139_p2), %v735_v4  ;;  %v845_v26 = vrot.slane (!%p139_p2), %v200_v24, %v204_v23  ;;  %v847_v27 = vrot.slane (!%p139_p2), %v200_v24, %v208_v25 }
   0xd   : > { %s904_s18 = smov (!%p163_p3, %s599_s18), 63  ;;  %333 = vmatprep.subr.bf16.mxu0 %v736_v5  ;;  %713 = vmatprep.subr.bf16.mxu1 %v736_v5 }
   0xe   : > { %s600_s25 = sshll.u32 %s904_s18, 2 }
   0xf   : > { %s815_s30 = scalar_lea.vmem %s899_s0, %s600_s25  ;;  %s862_s15 = scalar_lea.vmem %s902_s3, %s600_s25 }
  0x10   : > { %334 = vmatpush1.bf16.msra.mxu0 %v738_v6  ;;  %718 = vmatpush1.bf16.msra.mxu1 %v738_v6  ;;  %v744_v13 = vld [vmem:[%s815_s30] sm:$0xff]   ;;  %v746_v15 = vld [vmem:[%s815_s30 + $0x8] sm:$0xff]   ;;  %v748_v17 = vld [vmem:[%s815_s30 + $0x10] sm:$0xff]  }
  0x11   : > { %335 = vmatprep.subr.bf16.mxu0 %v739_v7  ;;  %714 = vmatprep.subr.bf16.mxu1 %v739_v7  ;;  %v745_v14 = vld [vmem:[%s815_s30 + $0x20] sm:$0xff]   ;;  %v747_v16 = vld [vmem:[%s815_s30 + $0x28] sm:$0xff]   ;;  %v749_v18 = vld [vmem:[%s815_s30 + $0x30] sm:$0xff]  }
  0x12   : > { %v750_v19 = vld [vmem:[%s815_s30 + $0x18] sm:$0xff]  }
  0x13   : > { %v751_v20 = vld [vmem:[%s815_s30 + $0x38] sm:$0xff]  }
  0x14   : > { %336 = vmatpush1.bf16.msra.mxu0 %v741_v9  ;;  %719 = vmatpush1.bf16.msra.mxu1 %v741_v9 }
  0x15   : > { %621 = vmatprep.subr.msk.bf16.mxu0 %vm322_vm0, %v620_v10  ;;  %715 = vmatprep.subr.msk.bf16.mxu1 %vm322_vm0, %v620_v10 }
  0x18   : > { %338 = vmatpush1.bf16.msra.mxu0 %v324_v12  ;;  %720 = vmatpush1.bf16.msra.mxu1 %v324_v12 }
  0x1b   : > { %622 = vmatmul.mubr.msk.bf16.vlgmr.msra.gmra.mrb[0].mxu0 %vm297_vm1, %v744_v13  ;;  %626 = vmatmul.mubr.msk.bf16.vlgmr.msra.gmra.mrb[0].mxu1 %vm297_vm1, %v745_v14 }
  0x1c   : > { %371 = vmatprep.mubr.bf16.mxu0 %v760_v2  ;;  %411 = vmatprep.mubr.bf16.mxu1 %v760_v2 }
  0x23   : > { %623 = vmatmul.mubr.msk.bf16.gmra.mrb[4].mxu0 %vm297_vm1, %v746_v15  ;;  %627 = vmatmul.mubr.msk.bf16.gmra.mrb[4].mxu1 %vm297_vm1, %v747_v16 }
  0x24   : > { %381 = vmatprep.mubr.bf16.mxu0 %v760_v2  ;;  %421 = vmatprep.mubr.bf16.mxu1 %v760_v2 }
  0x2b   : > { %624 = vmatmul.mubr.msk.bf16.gmra.mrb[8].mxu0 %vm297_vm1, %v748_v17  ;;  %628 = vmatmul.mubr.msk.bf16.gmra.mrb[8].mxu1 %vm297_vm1, %v749_v18 }
  0x2c   : > { %391 = vmatprep.mubr.bf16.mxu0 %v760_v2  ;;  %431 = vmatprep.mubr.bf16.mxu1 %v760_v2 }
  0x33   : > { %625 = vmatmul.mubr.msk.bf16.gmra.mrb[12].mxu0 %vm297_vm1, %v750_v19  ;;  %629 = vmatmul.mubr.msk.bf16.gmra.mrb[12].mxu1 %vm297_vm1, %v751_v20 }
  0xee   : > { %v363_v28 = vpop.f32.mrb[0].mxu0  ;;  %v403_v29 = vpop.f32.mrb[0].mxu1 }
  0xef   : > { %v364_v30 = vadd.f32 %v363_v28, %v845_v26  ;;  %v404_v31 = vadd.f32 %v403_v29, %v845_v26  ;;  %v365_v32 = vpop.f32.mrb[1].mxu0  ;;  %v405_v33 = vpop.f32.mrb[1].mxu1 }
  0xf0   : > { %v366_v34 = vadd.f32 %v365_v32, %v847_v27  ;;  %v406_v35 = vadd.f32 %v405_v33, %v847_v27  ;;  %v367_v36 = vpop.f32.mrb[2].mxu0  ;;  %v407_v37 = vpop.f32.mrb[2].mxu1 }
  0xf1   : > { %v368_v38 = vadd.f32 %v367_v36, %v845_v26  ;;  %v408_v39 = vadd.f32 %v407_v37, %v845_v26  ;;  %v369_v40 = vpop.f32.mrb[3].mxu0  ;;  %v409_v41 = vpop.f32.mrb[3].mxu1 }
  0xf2   : > { %v442_v42 = vmax.f32 %v364_v30, %v366_v34  ;;  %v450_v43 = vmax.f32 %v404_v31, %v406_v35  ;;  %v370_v44 = vadd.f32 %v369_v40, %v847_v27  ;;  %v410_v45 = vadd.f32 %v409_v41, %v847_v27 }
  0xf4   : > { %v443_v46 = vmax.f32 %v368_v38, %v370_v44  ;;  %v451_v47 = vmax.f32 %v408_v39, %v410_v45 }
  0xf6   : > { %v667_v48 = vpack.c.bf16 %v443_v46, %v442_v42  ;;  %v687_v49 = vpack.c.bf16 %v451_v47, %v450_v43  ;;  %v373_v50 = vpop.f32.mrb[4].mxu0  ;;  %v413_v51 = vpop.f32.mrb[4].mxu1 }
  0xf7   : > { %v374_v52 = vadd.f32 %v373_v50, %v845_v26  ;;  %v414_v53 = vadd.f32 %v413_v51, %v845_v26  ;;  %v375_v54 = vpop.f32.mrb[5].mxu0  ;;  %v415_v55 = vpop.f32.mrb[5].mxu1 }
  0xf8   : > { %668 = vst [vmem:[%s862_s15] sm:$0xff] %v667_v48   ;;  %707 = vst [vmem:[%s862_s15 + $0x20] sm:$0xff] %v687_v49   ;;  %v376_v56 = vadd.f32 %v375_v54, %v847_v27  ;;  %v416_v57 = vadd.f32 %v415_v55, %v847_v27  ;;  %v377_v58 = vpop.f32.mrb[6].mxu0  ;;  %v417_v59 = vpop.f32.mrb[6].mxu1 }
  0xf9   : > { %v378_v60 = vadd.f32 %v377_v58, %v845_v26  ;;  %v418_v61 = vadd.f32 %v417_v59, %v845_v26  ;;  %v379_v62 = vpop.f32.mrb[7].mxu0  ;;  %v419_v63 = vpop.f32.mrb[7].mxu1 }
  0xfa   : > { %v444_v0 = vmax.f32 %v374_v52, %v376_v56  ;;  %v452_v1 = vmax.f32 %v414_v53, %v416_v57  ;;  %v380_v2 = vadd.f32 %v379_v62, %v847_v27  ;;  %v420_v3 = vadd.f32 %v419_v63, %v847_v27 }
  0xfc   : > { %v445_v4 = vmax.f32 %v378_v60, %v380_v2  ;;  %v453_v5 = vmax.f32 %v418_v61, %v420_v3 }
  0xfe   : > { %v672_v6 = vpack.c.bf16 %v445_v4, %v444_v0  ;;  %v692_v7 = vpack.c.bf16 %v453_v5, %v452_v1  ;;  %v383_v8 = vpop.f32.mrb[8].mxu0  ;;  %v423_v9 = vpop.f32.mrb[8].mxu1 }
  0xff   : > { %v384_v10 = vadd.f32 %v383_v8, %v845_v26  ;;  %v424_v11 = vadd.f32 %v423_v9, %v845_v26  ;;  %v385_v12 = vpop.f32.mrb[9].mxu0  ;;  %v425_v13 = vpop.f32.mrb[9].mxu1 }
 0x100   : > { %704 = vst [vmem:[%s862_s15 + $0x8] sm:$0xff] %v672_v6   ;;  %708 = vst [vmem:[%s862_s15 + $0x28] sm:$0xff] %v692_v7   ;;  %v386_v14 = vadd.f32 %v385_v12, %v847_v27  ;;  %v426_v15 = vadd.f32 %v425_v13, %v847_v27  ;;  %v387_v16 = vpop.f32.mrb[10].mxu0  ;;  %v427_v17 = vpop.f32.mrb[10].mxu1 }
 0x101   : > { %v388_v18 = vadd.f32 %v387_v16, %v845_v26  ;;  %v428_v19 = vadd.f32 %v427_v17, %v845_v26  ;;  %v389_v20 = vpop.f32.mrb[11].mxu0  ;;  %v429_v21 = vpop.f32.mrb[11].mxu1 }
 0x102   : > { %v446_v22 = vmax.f32 %v384_v10, %v386_v14  ;;  %v454_v23 = vmax.f32 %v424_v11, %v426_v15  ;;  %v390_v24 = vadd.f32 %v389_v20, %v847_v27  ;;  %v430_v25 = vadd.f32 %v429_v21, %v847_v27 }
 0x104   : > { %v447_v28 = vmax.f32 %v388_v18, %v390_v24  ;;  %v455_v29 = vmax.f32 %v428_v19, %v430_v25 }
 0x106   : > { %v677_v30 = vpack.c.bf16 %v447_v28, %v446_v22  ;;  %v697_v31 = vpack.c.bf16 %v455_v29, %v454_v23  ;;  %v393_v32 = vpop.f32.mrb[12].mxu0  ;;  %v433_v33 = vpop.f32.mrb[12].mxu1 }
 0x107   : > { %v394_v34 = vadd.f32 %v393_v32, %v845_v26  ;;  %v434_v35 = vadd.f32 %v433_v33, %v845_v26  ;;  %v395_v36 = vpop.f32.mrb[13].mxu0  ;;  %v435_v37 = vpop.f32.mrb[13].mxu1 }
 0x108   : > { %705 = vst [vmem:[%s862_s15 + $0x10] sm:$0xff] %v677_v30   ;;  %709 = vst [vmem:[%s862_s15 + $0x30] sm:$0xff] %v697_v31   ;;  %v396_v38 = vadd.f32 %v395_v36, %v847_v27  ;;  %v436_v39 = vadd.f32 %v435_v37, %v847_v27  ;;  %v397_v40 = vpop.f32.mrb[14].mxu0  ;;  %v437_v41 = vpop.f32.mrb[14].mxu1 }
 0x109   : > { %v398_v42 = vadd.f32 %v397_v40, %v845_v26  ;;  %v438_v43 = vadd.f32 %v437_v41, %v845_v26  ;;  %v399_v44 = vpop.f32.mrb[15].mxu0  ;;  %v439_v45 = vpop.f32.mrb[15].mxu1 }
 0x10a   : > { %v448_v46 = vmax.f32 %v394_v34, %v396_v38  ;;  %v456_v47 = vmax.f32 %v434_v35, %v436_v39  ;;  %v400_v48 = vadd.f32 %v399_v44, %v847_v27  ;;  %v440_v49 = vadd.f32 %v439_v45, %v847_v27 }
 0x10c   : > { %v449_v50 = vmax.f32 %v398_v42, %v400_v48  ;;  %v457_v51 = vmax.f32 %v438_v43, %v440_v49 }
 0x10e   : > { %v682_v52 = vpack.c.bf16 %v449_v50, %v448_v46  ;;  %v702_v53 = vpack.c.bf16 %v457_v51, %v456_v47 }
 0x110   : > { %706 = vst [vmem:[%s862_s15 + $0x18] sm:$0xff] %v682_v52   ;;  %710 = vst [vmem:[%s862_s15 + $0x38] sm:$0xff] %v702_v53  }
 0x111 PF: > { %s13_s12 = sadd.s32 1, %s758_s12  }
 0x112   : > { %p10_p4 = scmp.ge.s32.totalorder %s13_s12, 6  }
 0x114   :  { %12 = sbr.rel (!%p10_p4) target bundleno = 1 (0x1), region = 62 }

</bundles_post_ra>
